<compile_context>
chip_gen: v7x
topology: tpu7x:2x2x1
jax: 0.10.0
libtpu: 0.0.40
codegen_flags: <defaults>
</compile_context>

<pallas_src>
import jax
import jax.numpy as jnp
from jax.experimental import pallas as pl
from jax.experimental.pallas import tpu as pltpu

BN_EPS = 1e-5
_VMEM_TILE_BUDGET_BYTES = 12 << 20   # budget for the 4 double-buffered x/out blocks
_VMEM_LIMIT_BYTES = 32 << 20         # explicit scoped-VMEM limit, safe on v5e/v6e/v7x


def _cbn_kernel(x_ref, gamma_ref, beta_ref, o_ref):
    # x_ref:     (N, c_tile, HW)  activations for one channel tile
    # gamma_ref: (N, c_tile, 1)   per-sample, per-channel scale
    # beta_ref:  (N, c_tile, 1)   per-sample, per-channel shift
    # o_ref:     (N, c_tile, HW)  output
    x = x_ref[...].astype(jnp.float32)

    # One-pass per-channel batch statistics over (N, HW)
    # (biased variance, matching torch BatchNorm2d's normalization stats).
    inv_n = 1.0 / (x.shape[0] * x.shape[2])
    s = jnp.sum(x, axis=(0, 2), keepdims=True)        # (1, c_tile, 1)
    ss = jnp.sum(x * x, axis=(0, 2), keepdims=True)   # (1, c_tile, 1)
    mean = s * inv_n
    var = ss * inv_n - mean * mean
    inv_std = jax.lax.rsqrt(var + BN_EPS)              # (1, c_tile, 1)

    # Fold BN normalization and the conditional affine into one scale/shift FMA.
    scale = gamma_ref[...].astype(jnp.float32) * inv_std      # (N, c_tile, 1)
    shift = beta_ref[...].astype(jnp.float32) - mean * scale  # (N, c_tile, 1)
    o_ref[...] = (x * scale + shift).astype(o_ref.dtype)


def _choose_c_tile(N, C, HW, itemsize):
    """Largest sublane-aligned channel tile whose 4 live blocks fit the VMEM budget."""
    per_channel = 4 * N * HW * itemsize          # 2 in + 2 out double-buffered blocks
    max_c = _VMEM_TILE_BUDGET_BYTES // per_channel
    if max_c >= C or C <= 8:
        return C                                 # whole channel axis fits -> 1D grid of cdiv(C, C)
    c_tile = max(8, (max_c // 8) * 8)            # multiple of 8 (f32 sublane)
    # Prefer a tile that divides C exactly (no ragged channel block).
    for t in range(c_tile, 7, -8):
        if C % t == 0:
            return t
    return c_tile                                # ragged tail: OOB reads masked, writes dropped


def conditional_batch_norm_2d(x, y, embed_weight):
    """Forward pass of ConditionalBatchNorm2d.

    x: (N, C, H, W) float, y: (N,) int class ids, embed_weight: (num_classes, 2*C).
    """
    N, C, H, W = x.shape
    HW = H * W

    # Embedding lookup + chunk into gamma / beta (tiny plain-JAX glue).
    # TODO(synk): could be fused via PrefetchScalarGridSpec(num_scalar_prefetch=1) on y.
    emb = embed_weight[y]                        # (N, 2*C)
    gamma = emb[:, :C].reshape(N, C, 1)          # (N, C, 1)
    beta = emb[:, C:].reshape(N, C, 1)           # (N, C, 1)

    x_flat = x.reshape(N, C, HW)

    c_tile = _choose_c_tile(N, C, HW, jnp.dtype(x.dtype).itemsize)
    grid = (pl.cdiv(C, c_tile),)

    out_flat = pl.pallas_call(
        _cbn_kernel,
        out_shape=jax.ShapeDtypeStruct((N, C, HW), x.dtype),
        grid=grid,
        in_specs=[
            pl.BlockSpec((N, c_tile, HW), lambda c: (0, c, 0)),
            pl.BlockSpec((N, c_tile, 1), lambda c: (0, c, 0)),
            pl.BlockSpec((N, c_tile, 1), lambda c: (0, c, 0)),
        ],
        out_specs=pl.BlockSpec((N, c_tile, HW), lambda c: (0, c, 0)),
        compiler_params=pltpu.CompilerParams(
            dimension_semantics=("parallel",),     # channel blocks are independent
            vmem_limit_bytes=_VMEM_LIMIT_BYTES,
        ),
    )(x_flat, gamma, beta)

    return out_flat.reshape(N, C, H, W)


def _reference(x, y, embed_weight):
    N, C, H, W = x.shape
    mean = jnp.mean(x, axis=(0, 2, 3), keepdims=True)
    var = jnp.mean((x - mean) ** 2, axis=(0, 2, 3), keepdims=True)
    x_hat = (x - mean) / jnp.sqrt(var + BN_EPS)
    emb = embed_weight[y]
    gamma = emb[:, :C].reshape(N, C, 1, 1)
    beta = emb[:, C:].reshape(N, C, 1, 1)
    return gamma * x_hat + beta


if __name__ == "__main__":
    num_features = 4
    num_classes = 10
    N, C, H, W = 2, num_features, 16, 16

    key = jax.random.PRNGKey(0)
    k_x, k_y, k_emb = jax.random.split(key, 3)

    # Deterministic parameter init matching the PyTorch module:
    #   embed.weight[:, :C] ~ Normal(1, 0.02), embed.weight[:, C:] = 0
    gamma_init = 1.0 + 0.02 * jax.random.normal(
        k_emb, (num_classes, num_features), dtype=jnp.float32)
    beta_init = jnp.zeros((num_classes, num_features), dtype=jnp.float32)
    embed_weight = jnp.concatenate([gamma_init, beta_init], axis=1)

    x = jax.random.normal(k_x, (N, C, H, W), dtype=jnp.float32)
    y = jax.random.randint(k_y, (N,), 0, num_classes, dtype=jnp.int32)

    out = conditional_batch_norm_2d(x, y, embed_weight)
    out = jax.block_until_ready(out)

    ref = _reference(x, y, embed_weight)
    assert out.shape == (N, C, H, W)
    assert jnp.max(jnp.abs(out - ref)) < 1e-4

    print("KERNEL_OK")
</pallas_src>

<mosaic_0001>
module attributes {stable_mosaic.version = 11 : i64} {
  func.func @_cbn_kernel(%arg0: i32, %arg1: memref<2x4x256xf32, #tpu.memory_space<vmem>>, %arg2: memref<2x4x1xf32, #tpu.memory_space<vmem>>, %arg3: memref<2x4x1xf32, #tpu.memory_space<vmem>>, %arg4: memref<2x4x256xf32, #tpu.memory_space<vmem>>) attributes {dimension_semantics = [#tpu.dimension_semantics<parallel>], iteration_bounds = array<i64: 1>, scalar_prefetch = 0 : i64, scratch_operands = 0 : i64, tpu.core_type = #tpu.core_type<tc>, window_params = [{transform_indices = @transform_0, window_bounds = array<i64: 2, 4, 256>}, {transform_indices = @transform_1, window_bounds = array<i64: 2, 4, 1>}, {transform_indices = @transform_2, window_bounds = array<i64: 2, 4, 1>}, {transform_indices = @transform_3, window_bounds = array<i64: 2, 4, 256>}]} {
    %c0 = arith.constant 0 : index
    %c0_0 = arith.constant 0 : index
    %c0_1 = arith.constant 0 : index
    %0 = vector.load %arg1[%c0, %c0_0, %c0_1] : memref<2x4x256xf32, #tpu.memory_space<vmem>>, vector<2x4x256xf32>
    %cst = arith.constant dense<0.000000e+00> : vector<4xf32>
    %1 = vector.multi_reduction <add>, %0, %cst [0, 2] : vector<2x4x256xf32> to vector<4xf32>
    %2 = vector.shape_cast %1 : vector<4xf32> to vector<1x4x1xf32>
    %3 = arith.mulf %0, %0 : vector<2x4x256xf32>
    %cst_2 = arith.constant dense<0.000000e+00> : vector<4xf32>
    %4 = vector.multi_reduction <add>, %3, %cst_2 [0, 2] : vector<2x4x256xf32> to vector<4xf32>
    %5 = vector.shape_cast %4 : vector<4xf32> to vector<1x4x1xf32>
    %cst_3 = arith.constant 0.001953125 : f32
    %6 = vector.broadcast %cst_3 : f32 to vector<1x4x1xf32>
    %7 = arith.mulf %2, %6 : vector<1x4x1xf32>
    %cst_4 = arith.constant 0.001953125 : f32
    %8 = vector.broadcast %cst_4 : f32 to vector<1x4x1xf32>
    %9 = arith.mulf %5, %8 : vector<1x4x1xf32>
    %10 = arith.mulf %7, %7 : vector<1x4x1xf32>
    %11 = arith.subf %9, %10 : vector<1x4x1xf32>
    %cst_5 = arith.constant 9.99999974E-6 : f32
    %12 = vector.broadcast %cst_5 : f32 to vector<1x4x1xf32>
    %13 = arith.addf %11, %12 : vector<1x4x1xf32>
    %14 = math.rsqrt %13 : vector<1x4x1xf32>
    %c0_6 = arith.constant 0 : index
    %c0_7 = arith.constant 0 : index
    %c0_8 = arith.constant 0 : index
    %15 = vector.load %arg2[%c0_6, %c0_7, %c0_8] : memref<2x4x1xf32, #tpu.memory_space<vmem>>, vector<2x4x1xf32>
    %16 = vector.broadcast %14 : vector<1x4x1xf32> to vector<2x4x1xf32>
    %17 = arith.mulf %15, %16 : vector<2x4x1xf32>
    %c0_9 = arith.constant 0 : index
    %c0_10 = arith.constant 0 : index
    %c0_11 = arith.constant 0 : index
    %18 = vector.load %arg3[%c0_9, %c0_10, %c0_11] : memref<2x4x1xf32, #tpu.memory_space<vmem>>, vector<2x4x1xf32>
    %19 = vector.broadcast %7 : vector<1x4x1xf32> to vector<2x4x1xf32>
    %20 = arith.mulf %19, %17 : vector<2x4x1xf32>
    %21 = arith.subf %18, %20 : vector<2x4x1xf32>
    %22 = vector.broadcast %17 : vector<2x4x1xf32> to vector<2x4x256xf32>
    %23 = arith.mulf %0, %22 : vector<2x4x256xf32>
    %24 = vector.broadcast %21 : vector<2x4x1xf32> to vector<2x4x256xf32>
    %25 = arith.addf %23, %24 : vector<2x4x256xf32>
    %c0_12 = arith.constant 0 : index
    %c0_13 = arith.constant 0 : index
    %c0_14 = arith.constant 0 : index
    %26 = vector.load %arg4[%c0_12, %c0_13, %c0_14] : memref<2x4x256xf32, #tpu.memory_space<vmem>>, vector<2x4x256xf32>
    tpu.vector_store %arg4[%c0_12, %c0_13, %c0_14], %25 {strides = array<i32>} : memref<2x4x256xf32, #tpu.memory_space<vmem>>, vector<2x4x256xf32>,
    return
  }
  func.func @transform_0(%arg0: i32) -> (i32, i32, i32) {
    %c0_i32 = arith.constant 0 : i32
    %c0_i32_0 = arith.constant 0 : i32
    %c0_i32_1 = arith.constant 0 : i32
    return %c0_i32, %arg0, %c0_i32_0 : i32, i32, i32
  }
  func.func @transform_1(%arg0: i32) -> (i32, i32, i32) {
    %c0_i32 = arith.constant 0 : i32
    %c0_i32_0 = arith.constant 0 : i32
    %c0_i32_1 = arith.constant 0 : i32
    return %c0_i32, %arg0, %c0_i32_0 : i32, i32, i32
  }
  func.func @transform_2(%arg0: i32) -> (i32, i32, i32) {
    %c0_i32 = arith.constant 0 : i32
    %c0_i32_0 = arith.constant 0 : i32
    %c0_i32_1 = arith.constant 0 : i32
    return %c0_i32, %arg0, %c0_i32_0 : i32, i32, i32
  }
  func.func @transform_3(%arg0: i32) -> (i32, i32, i32) {
    %c0_i32 = arith.constant 0 : i32
    %c0_i32_0 = arith.constant 0 : i32
    %c0_i32_1 = arith.constant 0 : i32
    return %c0_i32, %arg0, %c0_i32_0 : i32, i32, i32
  }
}

</mosaic_0001>

<bundles_post_ra>
// kernel: tpu_custom_call.1
= control target key start
LH: loop header
LB: loop body
LE: loop exit
PB: predicated region body
PF: predicated region fallthrough
CT: control target
= control target key end

     0   :  { %vm23_vm0 = vcmask 1043456   ;;  %s242_s0 = inlined_call_operand.vmem [shape: f32[2,4,256], index: 0, kind: input, shape index: {}]   ;;  %s243_s1 = inlined_call_operand.vmem [shape: f32[2,4,1], index: 1, kind: input, shape index: {}]   ;;  %s244_s2 = inlined_call_operand.vmem [shape: f32[2,4,1], index: 2, kind: input, shape index: {}]   ;;  %s245_s3 = inlined_call_operand.hbm [shape: f32[2,4,256], index: 3, kind: output, shape index: {}]  }
   0x1   :  { %v15_v0 = vld [vmem:[%s242_s0] sm:$0xff]  ;;  %v202_v1 = vld [vmem:[%s242_s0 + $0x8] sm:$0xff] }
   0x2   :  { %8 = vsyncpa [#allocation3], 0  ;;  %v19_v2 = vcombine.high %v15_v0, %v15_v0  ;;  %v20_v3 = vcombine.high %v202_v1, %v202_v1  ;;  %v24_v4 = vsel %vm23_vm0, %v15_v0, 0.0  ;;  %v33_v5 = vmul.f32 %v15_v0, %v15_v0  ;;  %v56_v30 = vld [vmem:[%s243_s1] sm:$0xf] }
   0x3   :  { %v34_v6 = vmul.f32 %v202_v1, %v202_v1  ;;  %v27_v8 = vsel %vm23_vm0, %v202_v1, 0.0  ;;  %v171_v22 = vmov 0   ;;  %v57_v31 = vld [vmem:[%s243_s1 + $0x4] sm:$0xf]  ;;  %v60_v35 = vld [vmem:[%s244_s2] sm:$0xf]  ;;  %v77_v43 = vlaneseq }
   0x4   :  { %v25_v7 = vsel %vm23_vm0, %v19_v2, 0.0  ;;  %v37_v10 = vcombine.high %v33_v5, %v33_v5  ;;  %v41_v12 = vsel %vm23_vm0, %v33_v5, 0.0  ;;  %v29_v13 = vsel %vm23_vm0, %v20_v3, 0.0  ;;  %141 = vset.pattern.permute.xlu1 %v171_v22  ;;  %142 = vset.pattern.permute.xlu0 %v171_v22  ;;  %v61_v39 = vld [vmem:[%s244_s2 + $0x4] sm:$0xf]  ;;  %s173_s1 = smov [#allocation2]  }
   0x5   :  { %v26_v9 = vadd.f32 %v25_v7, %v24_v4  ;;  %v38_v11 = vcombine.high %v34_v6, %v34_v6  ;;  %v44_v16 = vsel %vm23_vm0, %v34_v6, 0.0  ;;  %v172_v41 = vmov 839922192   ;;  %s125_s2 = sshll.u32 %s173_s1, 4  ;;  %s126_s2 = int_to_ptr.vmem [resolvable:$true] %s125_s2 }
   0x6   :  { %v42_v15 = vsel %vm23_vm0, %v37_v10, 0.0  ;;  %v75_v42 = vunpack.c.l.s4 %v172_v41  ;;  %v78_v45 = vshrl.u32 %v77_v43, 7  ;;  %s147_s23 = scalar_lea.vmem %s126_s2, 256  ;;  %p152_p1 = scmp.lt.s32.totalorder %s126_s2, %s126_s2 }
   0x7   :  { %v28_v14 = vadd.f32 %v27_v8, %v26_v9  ;;  %v43_v17 = vadd.f32 %v42_v15, %v41_v12  ;;  %v46_v19 = vsel %vm23_vm0, %v38_v11, 0.0  ;;  %p148_p0 = scmp.ne.s32.totalorder %s126_s2, %s147_s23  ;;  %p153_p2 = scmp.lt.s32.totalorder %s147_s23, %s147_s23 }
   0x8   :  { %v76_v44 = vunpack.c.0.s8 %v75_v42 }
   0x9   :  { %v30_v18 = vadd.f32 %v29_v13, %v28_v14  ;;  %v45_v20 = vadd.f32 %v44_v16, %v43_v17  ;;  %p154_p3 = por %p153_p2, %p152_p1 }
   0xa   :  { %v79_v46 = vsub.s32 %v76_v44, %v78_v45 }
   0xb   :  { %31 = vadd.xlane.f32.xlu0 %v30_v18  ;;  %v47_v21 = vadd.f32 %v46_v19, %v45_v20  ;;  %p155_p4 = pnand %p154_p3, %p148_p0 }
   0xf   :  { %48 = vadd.xlane.f32.xlu0 %v47_v21 }
  0x98   :  { %v32_v23 = vpop.xlane.xlu0 %31 }
  0x99   :  { %v50_v24 = vmul.f32 0.001953125, %v32_v23 }
  0x9b   :  { %v52_v26 = vmul.f32 %v50_v24, %v50_v24 }
  0x9c   :  { %v49_v25 = vpop.xlane.xlu0 %48 }
  0x9d   :  { %v51_v27 = vmul.f32 0.001953125, %v49_v25 }
  0x9f   :  { %v53_v28 = vsub.f32 %v51_v27, %v52_v26 }
  0xa1   :  { %v54_v29 = vadd.f32 1e-05, %v53_v28 }
  0xa3   :  { %145 = vrsqrt.f32 %v54_v29 }
  0xad   :  { %v146_v32 = vpop.eup %145 }
  0xae   :  { %v58_v33 = vmul.f32 %v146_v32, %v56_v30  ;;  %v59_v34 = vmul.f32 %v146_v32, %v57_v31 }
  0xb0   :  { %68 = vperm.xlu1 %141, %v58_v33   ;;  %v62_v36 = vmul.f32 %v58_v33, %v50_v24  ;;  %v63_v38 = vmul.f32 %v59_v34, %v50_v24 }
  0xb2   :  { %v64_v37 = vsub.f32 %v60_v35, %v62_v36  ;;  %v65_v40 = vsub.f32 %v61_v39, %v63_v38 }
  0xb4   :  { %72 = vperm.xlu1 %141, %v59_v34   ;;  %94 = vperm.xlu0 %142, %v64_v37  }
  0xb8   :  { %98 = vperm.xlu1 %141, %v65_v40  }
 0x12f   :  { %v69_v47 = vpop.permute.xlu1 %68 }
 0x130   :  { %v80_v48 = vrot.slane %v69_v47, %v79_v46 }
 0x132   :  { %v90_v51 = vmul.f32 %v80_v48, %v15_v0 }
 0x133   :  { %v73_v49 = vpop.permute.xlu1 %72  ;;  %v95_v50 = vpop.permute.xlu0 %94 }
 0x134   :  { %v87_v52 = vrot.slane %v73_v49, %v79_v46  ;;  %v106_v53 = vrot.slane %v95_v50, %v79_v46 }
 0x136   :  { %v116_v54 = vadd.f32 %v106_v53, %v90_v51  ;;  %v91_v56 = vmul.f32 %v87_v52, %v202_v1 }
 0x137   :  { %v99_v55 = vpop.permute.xlu1 %98 }
 0x138   :  { %118 = vst [vmem:[#allocation2] sm:$0xff] %v116_v54  ;;  %v113_v57 = vrot.slane %v99_v55, %v79_v46 }
 0x13a   :  { %v117_v58 = vadd.f32 %v113_v57, %v91_v56 }
 0x13c   :  { %119 = vst [vmem:[#allocation2 + $0x8] sm:$0xff] %v117_v58 }
 0x13d   :  { %158 = shalt.err (!%p155_p4)
}
 0x13e   :  { %s159_s26 = scalar_lea.hbm %s245_s3, 256 }
 0x13f   :  { %p160_p5 = scmp.ne.s32.totalorder %s245_s3, %s159_s26  ;;  %p163_p6 = scmp.lt.u32.totalorder %s159_s26, %s245_s3 }
 0x141   :  { %p165_p7 = pnand %p163_p6, %p160_p5 }
 0x143   :  { %168 = shalt.err (!%p165_p7)
}
 0x144   :  { %s174_s4 = smov 128   ;;  %s175_s5 = smov 8  }
 0x145   :  { %131 = dma.vmem_to_hbm [thread:$0]  %s126_s2, 256, %s245_s3, [#allocation3], %s174_s4, %s174_s4, %s175_s5  }
 0x146   :  { %169 = dma.done.wait [#allocation3], 256  }
 0x147   :  { %170 = vsyncadd [#allocation3], 4294967040 }
 0x148   :  { %135 = vsyncpa [#allocation3], 1 }

</bundles_post_ra>
